<compile_context>
chip_gen: v6e
topology: v6e:2x2x1
jax: 0.10.0
libtpu: 0.0.40
codegen_flags: <defaults>
</compile_context>

<pallas_src>
import math

import jax
import jax.numpy as jnp
from jax.experimental import pallas as pl
from jax.experimental.pallas import tpu as pltpu

N = 7        # emotion dimension
PAD = 128    # lane padding (TPU vreg lane width)


def emotion_kernel(x_ref, out_ref):
    # Packed input rows: 0 = representation, 1 = input_emotion, 2 = diag(weight_D)
    rep = x_ref[0:1, :]       # (1, 128)
    emo = x_ref[1:2, :]       # (1, 128)
    w_diag = x_ref[2:3, :]    # (1, 128)

    lane = jax.lax.broadcasted_iota(jnp.int32, (1, PAD), 1)
    valid = lane < N

    # raw_attention = input_emotion @ diag(representation).T / sqrt(7)
    #               = emo * rep / sqrt(7)  (key matrix is diagonal)
    raw = emo * rep * jnp.float32(1.0 / math.sqrt(N))
    raw = jnp.where(valid, raw, -jnp.inf)

    # softmax over the 7 valid lanes (padded lanes -> exp(-inf) = 0)
    m = jnp.max(raw, axis=-1, keepdims=True)
    e = jnp.exp(raw - m)                                   # (1, 128), 0 on padded lanes
    inv = pl.reciprocal(jnp.sum(e, axis=-1, keepdims=True), approx=True)
    s = e * inv

    # diagonal(diag(s^3) @ W^T) == s^3 * diag(W); then clamp to [-1, 1].
    s3 = s * s * s
    diff = jnp.clip(s3 * w_diag, -1.0, 1.0)                # padded lanes: 0 * 0 -> 0

    out_ref[...] = rep + diff


def emotion_forward(representation, input_emotion, weight_d):
    """representation, input_emotion: (7,) f32; weight_d: (7,7) f32 (torch Linear weight)."""
    rep = representation.astype(jnp.float32)
    emo = input_emotion.astype(jnp.float32)
    w_diag = jnp.diagonal(weight_d.astype(jnp.float32))    # only the diagonal is needed

    # Single packed (8, 128) f32 tile: rows 0..2 hold rep / emo / diag(W), rest zero.
    packed = jnp.zeros((8, PAD), jnp.float32)
    packed = packed.at[0, :N].set(rep)
    packed = packed.at[1, :N].set(emo)
    packed = packed.at[2, :N].set(w_diag)

    out = pl.pallas_call(
        emotion_kernel,
        out_shape=jax.ShapeDtypeStruct((1, PAD), jnp.float32),
        in_specs=[pl.BlockSpec(memory_space=pltpu.MemorySpace.VMEM)],
        out_specs=pl.BlockSpec(memory_space=pltpu.MemorySpace.VMEM),
    )(packed)
    return out[0, :N]


def emotion_reference(representation, input_emotion, weight_d):
    """Pure-JAX reference mirroring the PyTorch forward, for a correctness check."""
    rep = representation.astype(jnp.float32)
    emo = input_emotion.astype(jnp.float32)
    raw = (emo @ jnp.diag(rep).T) / jnp.sqrt(jnp.float32(N))
    score = jnp.diag(jax.nn.softmax(raw, axis=-1))
    lin = (score ** 3) @ weight_d.T
    diff = jnp.clip(jnp.diagonal(lin), -1.0, 1.0)
    return rep + diff


if __name__ == "__main__":
    key = jax.random.PRNGKey(0)
    k1, k2, k3 = jax.random.split(key, 3)

    representation = jax.random.uniform(k1, (N,), jnp.float32, minval=-1.0, maxval=1.0)
    input_emotion = jax.random.uniform(k2, (N,), jnp.float32, minval=0.0, maxval=1.0)
    # torch.nn.Linear(7, 7, bias=False) default init: U(-1/sqrt(7), 1/sqrt(7))
    bound = 1.0 / math.sqrt(N)
    weight_d = jax.random.uniform(k3, (N, N), jnp.float32, minval=-bound, maxval=bound)

    out = emotion_forward(representation, input_emotion, weight_d)
    out = jax.block_until_ready(out)

    ref = emotion_reference(representation, input_emotion, weight_d)
    assert out.shape == (N,)
    # slightly relaxed tolerance: kernel uses the EUP approximate reciprocal for the
    # softmax denominator (error well below 1e-4 on this path).
    assert jnp.allclose(out, ref, atol=1e-4, rtol=1e-4), (out, ref)

    print("KERNEL_OK")
</pallas_src>

<mosaic_0001>
module attributes {stable_mosaic.version = 11 : i64} {
  func.func @emotion_kernel(%arg0: memref<8x128xf32, #tpu.memory_space<vmem>>, %arg1: memref<1x128xf32, #tpu.memory_space<vmem>>) attributes {dimension_semantics = [], scalar_prefetch = 0 : i64, scratch_operands = 0 : i64, tpu.core_type = #tpu.core_type<tc>} {
    %c0 = arith.constant 0 : index
    %c0_0 = arith.constant 0 : index
    %0 = vector.load %arg0[%c0, %c0_0] : memref<8x128xf32, #tpu.memory_space<vmem>>, vector<1x128xf32>
    %c1 = arith.constant 1 : index
    %c0_1 = arith.constant 0 : index
    %1 = vector.load %arg0[%c1, %c0_1] : memref<8x128xf32, #tpu.memory_space<vmem>>, vector<1x128xf32>
    %c2 = arith.constant 2 : index
    %c0_2 = arith.constant 0 : index
    %2 = vector.load %arg0[%c2, %c0_2] : memref<8x128xf32, #tpu.memory_space<vmem>>, vector<1x128xf32>
    %3 = tpu.iota {dimensions = array<i32: 1>} : vector<1x128xi32>
    %c7_i32 = arith.constant 7 : i32
    %4 = vector.broadcast %c7_i32 : i32 to vector<1x128xi32>
    %5 = arith.cmpi slt, %3, %4 : vector<1x128xi32>
    %6 = arith.mulf %1, %0 : vector<1x128xf32>
    %cst = arith.constant 0.377964467 : f32
    %7 = vector.broadcast %cst : f32 to vector<1x128xf32>
    %8 = arith.mulf %6, %7 : vector<1x128xf32>
    %cst_3 = arith.constant 0xFF800000 : f32
    %9 = vector.broadcast %cst_3 : f32 to vector<1x128xf32>
    %10 = arith.select %5, %8, %9 : vector<1x128xi1>, vector<1x128xf32>
    %cst_4 = arith.constant dense<0xFF800000> : vector<1xf32>
    %11 = vector.multi_reduction <maximumf>, %10, %cst_4 [1] : vector<1x128xf32> to vector<1xf32>
    %12 = vector.shape_cast %11 : vector<1xf32> to vector<1x1xf32>
    %13 = vector.broadcast %12 : vector<1x1xf32> to vector<1x128xf32>
    %14 = arith.subf %10, %13 : vector<1x128xf32>
    %15 = math.exp %14 : vector<1x128xf32>
    %cst_5 = arith.constant dense<0.000000e+00> : vector<1xf32>
    %16 = vector.multi_reduction <add>, %15, %cst_5 [1] : vector<1x128xf32> to vector<1xf32>
    %17 = vector.shape_cast %16 : vector<1xf32> to vector<1x1xf32>
    %18 = tpu.reciprocal %17 {approx = true} : vector<1x1xf32> -> vector<1x1xf32>
    %19 = vector.broadcast %18 : vector<1x1xf32> to vector<1x128xf32>
    %20 = arith.mulf %15, %19 : vector<1x128xf32>
    %21 = arith.mulf %20, %20 : vector<1x128xf32>
    %22 = arith.mulf %21, %20 : vector<1x128xf32>
    %23 = arith.mulf %22, %2 : vector<1x128xf32>
    %cst_6 = arith.constant -1.000000e+00 : f32
    %cst_7 = arith.constant 1.000000e+00 : f32
    %24 = vector.broadcast %cst_6 : f32 to vector<1x128xf32>
    %25 = arith.maximumf %24, %23 : vector<1x128xf32>
    %26 = vector.broadcast %cst_7 : f32 to vector<1x128xf32>
    %27 = arith.minimumf %26, %25 : vector<1x128xf32>
    %28 = arith.addf %0, %27 : vector<1x128xf32>
    %c0_8 = arith.constant 0 : index
    %c0_9 = arith.constant 0 : index
    %29 = vector.load %arg1[%c0_8, %c0_9] : memref<1x128xf32, #tpu.memory_space<vmem>>, vector<1x128xf32>
    tpu.vector_store %arg1[%c0_8, %c0_9], %28 {strides = array<i32>} : memref<1x128xf32, #tpu.memory_space<vmem>>, vector<1x128xf32>,
    return
  }
}

</mosaic_0001>

<bundles_post_ra>
// kernel: tpu_custom_call.1
= control target key start
LH: loop header
LB: loop body
LE: loop exit
PB: predicated region body
PF: predicated region fallthrough
CT: control target
= control target key end

     0   :  { %6 = vsyncpa [#allocation3], 0  ;;  %s133_s0 = inlined_call_operand.hbm [shape: f32[8,128], index: 0, kind: input, shape index: {}]   ;;  %s134_s1 = inlined_call_operand.hbm [shape: f32[1,128], index: 1, kind: output, shape index: {}]  }
   0x1   :  { %7 = vsyncpa [#allocation4], 0  ;;  %s115_s6 = smov [#allocation2]  }
   0x2   :  { %s14_s7 = sshll.u32 %s115_s6, 4  ;;  %s15_s7 = int_to_ptr.vmem [resolvable:$true] %s14_s7 }
   0x3   :  { %s79_s8 = scalar_lea.vmem %s15_s7, 128  ;;  %p84_p1 = scmp.lt.s32.totalorder %s15_s7, %s15_s7 }
   0x4   :  { %p80_p0 = scmp.ne.s32.totalorder %s15_s7, %s79_s8  ;;  %p85_p2 = scmp.lt.s32.totalorder %s79_s8, %s79_s8 }
   0x6   :  { %p86_p3 = por %p85_p2, %p84_p1 }
   0x8   :  { %p87_p4 = pnand %p86_p3, %p80_p0 }
   0xa   :  { %90 = shalt.err (!%p87_p4)
}
   0xb   :  { %17 = dma.hbm_to_vmem [thread:$0]  %s133_s0, 128, %s15_s7, [#allocation3]  }
   0xc   :  { %111 = dma.done.wait [#allocation3], 128  }
   0xd   :  { %112 = vsyncadd [#allocation3], 4294967168  ;;  %v24_v0 = vlaneseq  ;;  %v21_v2 = vld [vmem:[#allocation2] sm:$0x1]  ;;  %v22_v3 = vld [vmem:[#allocation2 + $0x1] sm:$0x1] }
   0xe   :  { %v27_v4 = vmul.f32 %v22_v3, %v21_v2  ;;  %vm30_vm1 = vcmask 1040384   ;;  %v23_v17 = vld [vmem:[#allocation2 + $0x2] sm:$0x1]  ;;  %s116_s0 = smov [#allocation5]  }
   0xf   :  { %v25_v1 = vand.u32 127, %v24_v0  ;;  %s55_s11 = sshll.u32 %s116_s0, 4  ;;  %s56_s11 = int_to_ptr.vmem [resolvable:$true] %s55_s11 }
  0x10   :  { %v28_v5 = vmul.f32 0.37796447, %v27_v4  ;;  %s91_s12 = scalar_lea.vmem %s56_s11, 16  ;;  %s95_s13 = scalar_lea.vmem %s56_s11, 32 }
  0x11   :  { %vm26_vm0 = vcmp.lt.s32.totalorder %v25_v1, 7  ;;  %p92_p5 = scmp.ne.s32.totalorder %s56_s11, %s91_s12  ;;  %p96_p6 = scmp.lt.s32.totalorder %s56_s11, %s56_s11 }
  0x12   :  { %v29_v6 = vsel %vm26_vm0, %v28_v5, -inf  ;;  %p97_p7 = scmp.lt.s32.totalorder %s95_s13, %s91_s12 }
  0x13   :  { %v31_v7 = vsel %vm30_vm1, %v29_v6, -inf }
  0x14   :  { %32 = vmax.xlane.f32.xlu0 %v31_v7  ;;  %p98_p8 = por %p97_p7, %p96_p6 }
  0x16   :  { %p99_p9 = pnand %p98_p8, %p92_p5 }
  0x9d   :  { %v33_v8 = vpop.xlane.xlu0 %32 }
  0x9e   :  { %v34_v9 = vsub.f32 %v29_v6, %v33_v8 }
  0xa0   :  { %v35_v10 = vmul.f32 1.442695, %v34_v9 }
  0xa2   :  { %67 = vpow2.f32 %v35_v10 }
  0xaf   :  { %v68_v11 = vpop.eup %67 }
  0xb0   :  { %v37_v12 = vsel %vm30_vm1, %v68_v11, 0.0 }
  0xb1   :  { %38 = vadd.xlane.f32.xlu0 %v37_v12 }
 0x13a   :  { %v39_v13 = vpop.xlane.xlu0 %38 }
 0x13b   :  { %69 = vrcp.f32 %v39_v13 }
 0x148   :  { %v70_v14 = vpop.eup %69 }
 0x149   :  { %v41_v15 = vmul.f32 %v70_v14, %v68_v11 }
 0x14b   :  { %v42_v16 = vmul.f32 %v41_v15, %v41_v15 }
 0x14d   :  { %v43_v18 = vmul.f32 %v42_v16, %v41_v15 }
 0x14f   :  { %v44_v19 = vmul.f32 %v43_v18, %v23_v17 }
 0x151   :  { %v64_v20 = vclamps-f32 %v44_v19, 1.0 }
 0x153   :  { %v47_v21 = vadd.f32 %v64_v20, %v21_v2 }
 0x155   :  { %48 = vst [vmem:[#allocation5] sm:$0x1] %v47_v21 }
 0x156   :  { %102 = shalt.err (!%p99_p9)
}
 0x157   :  { %58 = dma.vmem_to_hbm [thread:$0]  %s56_s11, 16, %s134_s1, [#allocation4]  }
 0x158   :  { %113 = dma.done.wait [#allocation4], 16  }
 0x159   :  { %114 = vsyncadd [#allocation4], 4294967280 }
 0x15a   :  { %62 = vsyncpa [#allocation3], 1 }
 0x15b   :  { %63 = vsyncpa [#allocation4], 1 }

</bundles_post_ra>
